<compile_context>
chip_gen: v6e
topology: v6e:2x2x1
jax: 0.10.0
libtpu: 0.0.40
codegen_flags: <defaults>
</compile_context>

<pallas_src>
import functools

import jax
import jax.numpy as jnp
from jax.experimental import pallas as pl
from jax.experimental.pallas import tpu as pltpu

_LANE = 128


def _round_up(v: int, m: int) -> int:
    return ((v + m - 1) // m) * m


def _fcnet_fused_kernel(*refs, num_layers: int):
    """Fused MLP over one batch tile.

    refs = (x_ref, w_ref_0..w_ref_{L-1}, b_ref_0..b_ref_{L-1}, o_ref)
      x_ref:   (TILE_N, K0_pad)        f32    (cast to bf16 in-kernel)
      w_ref_l: (Kl_pad, D{l+1}_pad)    bf16   (VMEM-resident, constant index_map)
      b_ref_l: (1, D{l+1}_pad)         f32    (VMEM-resident, constant index_map)
      o_ref:   (TILE_N, Dlast_pad)     bf16   (lane-dense store)
    """
    x_ref = refs[0]
    w_refs = refs[1:1 + num_layers]
    b_refs = refs[1 + num_layers:1 + 2 * num_layers]
    o_ref = refs[1 + 2 * num_layers]

    h = x_ref[...].astype(jnp.bfloat16)          # f32 -> bf16 cast fused in-kernel
    for l in range(num_layers):                  # unrolled: whole net in one body
        acc = jnp.dot(h, w_refs[l][...], preferred_element_type=jnp.float32)
        acc = acc + b_refs[l][...]               # (1, D) bias broadcast, f32 epilogue
        if l < num_layers - 1:
            h = jnp.maximum(acc, 0.0).astype(jnp.bfloat16)   # ReLU, back to bf16 for MXU
        else:
            o_ref[...] = acc.astype(o_ref.dtype)             # lane-dense bf16 store


def init_fcnet_params(key, in_features, hidden_features, out_features):
    """Deterministic init mirroring FCNet.__init__ (add_BN=False):
    - hidden layers: kaiming_normal (fan_in, relu)  -> std = sqrt(2 / fan_in)
    - last layer:    xavier_normal                  -> std = sqrt(2 / (fan_in + fan_out))
    - biases:        PyTorch Linear default U(-1/sqrt(fan_in), 1/sqrt(fan_in))
    Weights are returned pre-transposed to [in, out], float32.
    """
    sizes = (in_features,) + tuple(hidden_features) + (out_features,)
    num_affine = len(sizes) - 1
    params = []
    for idx in range(num_affine):
        fan_in, fan_out = sizes[idx], sizes[idx + 1]
        key, kw, kb = jax.random.split(key, 3)
        if idx < num_affine - 1:
            std = (2.0 / fan_in) ** 0.5
        else:
            std = (2.0 / (fan_in + fan_out)) ** 0.5
        w = jax.random.normal(kw, (fan_out, fan_in), jnp.float32) * std
        bound = 1.0 / (fan_in ** 0.5)
        b = jax.random.uniform(kb, (fan_out,), jnp.float32, minval=-bound, maxval=bound)
        params.append((w.T, b))
    return params


def prepare_fcnet_params(params):
    """Zero-pad:
      - first-layer K to a multiple of 16 (bf16 sublane packing), NOT 128 lanes;
      - every output dim to a multiple of 128 lanes (MXU / lane-dense stores);
    cast weights to bf16, keep biases in f32 as (1, D_pad) per-layer refs.
    (Note: for genuinely large hidden dims on v6e/v7x one would pad K/N to 256
    for the 256x256 MXU; irrelevant at these sizes.)
    """
    d_in = params[0][0].shape[0]
    k_pad = _round_up(d_in, 16)
    out_pdims = [_round_up(w_t.shape[1], _LANE) for w_t, _ in params]

    w_padded, b_padded = [], []
    for l, (w_t, b) in enumerate(params):
        wp = jnp.zeros((k_pad, out_pdims[l]), jnp.float32)
        wp = wp.at[:w_t.shape[0], :w_t.shape[1]].set(w_t)
        w_padded.append(wp.astype(jnp.bfloat16))

        bp = jnp.zeros((1, out_pdims[l]), jnp.float32)
        bp = bp.at[0, :b.shape[0]].set(b)
        b_padded.append(bp)

        k_pad = out_pdims[l]
    return tuple(w_padded), tuple(b_padded)


def _choose_tile_n(n: int, target: int) -> int:
    """Batch-tile size: large (amortize per-step overhead) but guaranteeing >= 2
    grid steps whenever the batch allows, so v7x's 2 TensorCores both get work.
    Multiple of 128 when big, else multiple of 16 (bf16 output sublane tile)."""
    if n <= 16:
        return 16
    half = -(-n // 2)                      # cdiv(n, 2): at least 2 grid steps
    tile = min(target, half)
    align = 128 if tile >= 128 else 16
    return _round_up(tile, align)


def _estimate_vmem_bytes(tile_n, k0_pad, out_pdims):
    """Conservative VMEM estimate (assumes default double-buffering everywhere)."""
    nbuf = 2
    w_bytes = 0
    k = k0_pad
    for d in out_pdims:
        w_bytes += k * d * 2               # bf16 weights
        k = d
    w_bytes *= nbuf
    b_bytes = sum(8 * d * 4 for d in out_pdims) * nbuf   # (1,D) padded to 8 sublanes
    x_bytes = tile_n * k0_pad * 4 * nbuf                  # f32 input tile
    o_bytes = tile_n * out_pdims[-1] * 2 * nbuf           # bf16 output tile
    act_bytes = tile_n * max(out_pdims) * (4 + 2 + 4)     # f32 acc + bf16 h + temp
    return w_bytes + b_bytes + x_bytes + o_bytes + act_bytes


@functools.partial(jax.jit, static_argnames=("out_features", "tile_target"))
def fcnet_forward(x, w_padded, b_padded, *, out_features: int, tile_target: int = 2048):
    """Fused forward pass. Matches FCNet.forward with add_BN=False.

    x: (N, in_features) float32. Returns (N, out_features) float32.
    Whole wrapper is jitted: pad/cast/slice fuse around the single pallas_call.
    """
    n, d_in = x.shape
    num_layers = len(w_padded)
    k0_pad = w_padded[0].shape[0]
    out_pdims = tuple(w.shape[1] for w in w_padded)

    tile_n = _choose_tile_n(n, tile_target)
    n_pad = _round_up(max(n, tile_n), tile_n)

    # Tiny pad only (rows + at most 15 lanes), in f32; fused under jit.
    x_p = jnp.pad(x, ((0, n_pad - n), (0, k0_pad - d_in)))

    kernel = functools.partial(_fcnet_fused_kernel, num_layers=num_layers)

    in_specs = [pl.BlockSpec((tile_n, k0_pad), lambda i: (i, 0))]
    # Weights/biases: constant block index -> DMA'd once, VMEM-resident across steps.
    in_specs += [pl.BlockSpec(w.shape, lambda i: (0, 0)) for w in w_padded]
    in_specs += [pl.BlockSpec(b.shape, lambda i: (0, 0)) for b in b_padded]

    vmem_est = _estimate_vmem_bytes(tile_n, k0_pad, out_pdims)
    # Budget from actual sizes; cap at 64 MiB so it is safe on v7x as well as v5e/v6e.
    vmem_limit = int(min(max(2 * vmem_est, 32 * 1024 * 1024), 64 * 1024 * 1024))

    out_p = pl.pallas_call(
        kernel,
        out_shape=jax.ShapeDtypeStruct((n_pad, out_pdims[-1]), jnp.bfloat16),
        grid=(n_pad // tile_n,),
        in_specs=in_specs,
        out_specs=pl.BlockSpec((tile_n, out_pdims[-1]), lambda i: (i, 0)),
        compiler_params=pltpu.CompilerParams(
            dimension_semantics=("parallel",),   # batch tiles independent (2 TCs on v7x)
            vmem_limit_bytes=vmem_limit,
        ),
    )(x_p, *w_padded, *b_padded)

    return out_p[:n, :out_features].astype(jnp.float32)


def fcnet_forward_ref(x, params):
    """Pure-JAX float32 reference (exact PyTorch semantics)."""
    n_layers = len(params)
    cur = x
    for idx, (w_t, b) in enumerate(params):
        cur = cur @ w_t + b
        if idx < n_layers - 1:
            cur = jnp.maximum(cur, 0.0)
    return cur


def fcnet_forward_ref_bf16(x, params):
    """Pure-JAX reference mirroring the kernel's bf16-matmul / f32-epilogue precision."""
    n_layers = len(params)
    h = x.astype(jnp.bfloat16)
    out = None
    for idx, (w_t, b) in enumerate(params):
        y = jnp.dot(h, w_t.astype(jnp.bfloat16), preferred_element_type=jnp.float32)
        y = y + b[None, :]
        if idx < n_layers - 1:
            h = jnp.maximum(y, 0.0).astype(jnp.bfloat16)
        else:
            out = y
    return out


if __name__ == "__main__":
    in_features = 16
    hidden_features = (32, 32)
    out_features = 8
    batch = 200

    key = jax.random.PRNGKey(0)
    key, kx = jax.random.split(key)
    x = jax.random.normal(kx, (batch, in_features), jnp.float32)

    params = init_fcnet_params(key, in_features, hidden_features, out_features)
    w_padded, b_padded = prepare_fcnet_params(params)

    ref_f32 = fcnet_forward_ref(x, params)
    ref_bf16 = fcnet_forward_ref_bf16(x, params)

    # Default tile choice: batch=200 -> 2 grid steps of 112 rows (>=2 for v7x).
    out = jax.block_until_ready(
        fcnet_forward(x, w_padded, b_padded, out_features=out_features))
    assert out.shape == (batch, out_features)
    # Tolerances: tight vs. precision-matched bf16 reference (output is bf16-rounded),
    # loose vs. pure-f32 PyTorch semantics.
    assert jnp.allclose(out, ref_bf16, atol=1e-2, rtol=1e-2), "mismatch vs bf16 reference"
    assert jnp.allclose(out, ref_f32, atol=5e-2, rtol=5e-2), "mismatch vs f32 reference"

    # Smaller tiles -> 4 grid steps, exercises the multi-step pipelined path.
    out_tiled = jax.block_until_ready(
        fcnet_forward(x, w_padded, b_padded, out_features=out_features, tile_target=64))
    assert out_tiled.shape == (batch, out_features)
    assert jnp.allclose(out_tiled, ref_bf16, atol=1e-2, rtol=1e-2), "tiled mismatch vs bf16 reference"
    assert jnp.allclose(out_tiled, ref_f32, atol=5e-2, rtol=5e-2), "tiled mismatch vs f32 reference"

    print("KERNEL_OK")
</pallas_src>

<mosaic_0001>
module attributes {stable_mosaic.version = 11 : i64} {
  func.func @_fcnet_fused_kernel(%arg0: i32, %arg1: memref<112x16xf32, #tpu.memory_space<vmem>>, %arg2: memref<16x128xbf16, #tpu.memory_space<vmem>>, %arg3: memref<128x128xbf16, #tpu.memory_space<vmem>>, %arg4: memref<128x128xbf16, #tpu.memory_space<vmem>>, %arg5: memref<1x128xf32, #tpu.memory_space<vmem>>, %arg6: memref<1x128xf32, #tpu.memory_space<vmem>>, %arg7: memref<1x128xf32, #tpu.memory_space<vmem>>, %arg8: memref<112x128xbf16, #tpu.memory_space<vmem>>) attributes {dimension_semantics = [#tpu.dimension_semantics<parallel>], iteration_bounds = array<i64: 2>, scalar_prefetch = 0 : i64, scratch_operands = 0 : i64, tpu.core_type = #tpu.core_type<tc>, window_params = [{transform_indices = @transform_0, window_bounds = array<i64: 112, 16>}, {pipeline_mode = #tpu.pipeline_mode<synchronous>, transform_indices = @transform_1, window_bounds = array<i64: 16, 128>}, {pipeline_mode = #tpu.pipeline_mode<synchronous>, transform_indices = @transform_2, window_bounds = array<i64: 128, 128>}, {pipeline_mode = #tpu.pipeline_mode<synchronous>, transform_indices = @transform_3, window_bounds = array<i64: 128, 128>}, {pipeline_mode = #tpu.pipeline_mode<synchronous>, transform_indices = @transform_4, window_bounds = array<i64: 1, 128>}, {pipeline_mode = #tpu.pipeline_mode<synchronous>, transform_indices = @transform_5, window_bounds = array<i64: 1, 128>}, {pipeline_mode = #tpu.pipeline_mode<synchronous>, transform_indices = @transform_6, window_bounds = array<i64: 1, 128>}, {transform_indices = @transform_7, window_bounds = array<i64: 112, 128>}]} {
    %c0 = arith.constant 0 : index
    %c0_0 = arith.constant 0 : index
    %0 = vector.load %arg1[%c0, %c0_0] : memref<112x16xf32, #tpu.memory_space<vmem>>, vector<112x16xf32>
    %1 = arith.truncf %0 : vector<112x16xf32> to vector<112x16xbf16>
    %c0_1 = arith.constant 0 : index
    %c0_2 = arith.constant 0 : index
    %2 = vector.load %arg2[%c0_1, %c0_2] : memref<16x128xbf16, #tpu.memory_space<vmem>>, vector<16x128xbf16>
    %cst = arith.constant dense<0.000000e+00> : vector<112x128xf32>
    %3 = tpu.matmul %1, %2, %cst {dimension_numbers = #tpu.dot_dimension_numbers<[1], [0], [0], [1], [0, 0, 1, 1], [], []>} : vector<112x16xbf16>, vector<16x128xbf16>, vector<112x128xf32> -> vector<112x128xf32>
    %c0_3 = arith.constant 0 : index
    %c0_4 = arith.constant 0 : index
    %4 = vector.load %arg5[%c0_3, %c0_4] : memref<1x128xf32, #tpu.memory_space<vmem>>, vector<1x128xf32>
    %5 = vector.broadcast %4 : vector<1x128xf32> to vector<112x128xf32>
    %6 = arith.addf %3, %5 : vector<112x128xf32>
    %cst_5 = arith.constant 0.000000e+00 : f32
    %7 = vector.broadcast %cst_5 : f32 to vector<112x128xf32>
    %8 = arith.maximumf %6, %7 : vector<112x128xf32>
    %9 = arith.truncf %8 : vector<112x128xf32> to vector<112x128xbf16>
    %c0_6 = arith.constant 0 : index
    %c0_7 = arith.constant 0 : index
    %10 = vector.load %arg3[%c0_6, %c0_7] : memref<128x128xbf16, #tpu.memory_space<vmem>>, vector<128x128xbf16>
    %cst_8 = arith.constant dense<0.000000e+00> : vector<112x128xf32>
    %11 = tpu.matmul %9, %10, %cst_8 {dimension_numbers = #tpu.dot_dimension_numbers<[1], [0], [0], [1], [0, 0, 1, 1], [], []>} : vector<112x128xbf16>, vector<128x128xbf16>, vector<112x128xf32> -> vector<112x128xf32>
    %c0_9 = arith.constant 0 : index
    %c0_10 = arith.constant 0 : index
    %12 = vector.load %arg6[%c0_9, %c0_10] : memref<1x128xf32, #tpu.memory_space<vmem>>, vector<1x128xf32>
    %13 = vector.broadcast %12 : vector<1x128xf32> to vector<112x128xf32>
    %14 = arith.addf %11, %13 : vector<112x128xf32>
    %cst_11 = arith.constant 0.000000e+00 : f32
    %15 = vector.broadcast %cst_11 : f32 to vector<112x128xf32>
    %16 = arith.maximumf %14, %15 : vector<112x128xf32>
    %17 = arith.truncf %16 : vector<112x128xf32> to vector<112x128xbf16>
    %c0_12 = arith.constant 0 : index
    %c0_13 = arith.constant 0 : index
    %18 = vector.load %arg4[%c0_12, %c0_13] : memref<128x128xbf16, #tpu.memory_space<vmem>>, vector<128x128xbf16>
    %cst_14 = arith.constant dense<0.000000e+00> : vector<112x128xf32>
    %19 = tpu.matmul %17, %18, %cst_14 {dimension_numbers = #tpu.dot_dimension_numbers<[1], [0], [0], [1], [0, 0, 1, 1], [], []>} : vector<112x128xbf16>, vector<128x128xbf16>, vector<112x128xf32> -> vector<112x128xf32>
    %c0_15 = arith.constant 0 : index
    %c0_16 = arith.constant 0 : index
    %20 = vector.load %arg7[%c0_15, %c0_16] : memref<1x128xf32, #tpu.memory_space<vmem>>, vector<1x128xf32>
    %21 = vector.broadcast %20 : vector<1x128xf32> to vector<112x128xf32>
    %22 = arith.addf %19, %21 : vector<112x128xf32>
    %23 = arith.truncf %22 : vector<112x128xf32> to vector<112x128xbf16>
    %c0_17 = arith.constant 0 : index
    %c0_18 = arith.constant 0 : index
    %24 = vector.load %arg8[%c0_17, %c0_18] : memref<112x128xbf16, #tpu.memory_space<vmem>>, vector<112x128xbf16>
    tpu.vector_store %arg8[%c0_17, %c0_18], %23 {strides = array<i32>} : memref<112x128xbf16, #tpu.memory_space<vmem>>, vector<112x128xbf16>,
    return
  }
  func.func @transform_0(%arg0: i32) -> (i32, i32) {
    %c0_i32 = arith.constant 0 : i32
    %c0_i32_0 = arith.constant 0 : i32
    return %arg0, %c0_i32 : i32, i32
  }
  func.func @transform_1(%arg0: i32) -> (i32, i32) {
    %c0_i32 = arith.constant 0 : i32
    %c0_i32_0 = arith.constant 0 : i32
    %c0_i32_1 = arith.constant 0 : i32
    return %c0_i32, %c0_i32_0 : i32, i32
  }
  func.func @transform_2(%arg0: i32) -> (i32, i32) {
    %c0_i32 = arith.constant 0 : i32
    %c0_i32_0 = arith.constant 0 : i32
    %c0_i32_1 = arith.constant 0 : i32
    return %c0_i32, %c0_i32_0 : i32, i32
  }
  func.func @transform_3(%arg0: i32) -> (i32, i32) {
    %c0_i32 = arith.constant 0 : i32
    %c0_i32_0 = arith.constant 0 : i32
    %c0_i32_1 = arith.constant 0 : i32
    return %c0_i32, %c0_i32_0 : i32, i32
  }
  func.func @transform_4(%arg0: i32) -> (i32, i32) {
    %c0_i32 = arith.constant 0 : i32
    %c0_i32_0 = arith.constant 0 : i32
    %c0_i32_1 = arith.constant 0 : i32
    return %c0_i32, %c0_i32_0 : i32, i32
  }
  func.func @transform_5(%arg0: i32) -> (i32, i32) {
    %c0_i32 = arith.constant 0 : i32
    %c0_i32_0 = arith.constant 0 : i32
    %c0_i32_1 = arith.constant 0 : i32
    return %c0_i32, %c0_i32_0 : i32, i32
  }
  func.func @transform_6(%arg0: i32) -> (i32, i32) {
    %c0_i32 = arith.constant 0 : i32
    %c0_i32_0 = arith.constant 0 : i32
    %c0_i32_1 = arith.constant 0 : i32
    return %c0_i32, %c0_i32_0 : i32, i32
  }
  func.func @transform_7(%arg0: i32) -> (i32, i32) {
    %c0_i32 = arith.constant 0 : i32
    %c0_i32_0 = arith.constant 0 : i32
    return %arg0, %c0_i32 : i32, i32
  }
}

</mosaic_0001>

<bundles_post_ra>
// kernel: fcnet_forward.1
= control target key start
LH: loop header
LB: loop body
LE: loop exit
PB: predicated region body
PF: predicated region fallthrough
CT: control target
= control target key end

     0   :  { %s1258_s24 = smov 0   ;;  %s1463_s0 = inlined_call_operand.vmem [shape: f32[224,16], index: 0, kind: input, shape index: {}]   ;;  %s1464_s1 = inlined_call_operand.vmem [shape: bf16[16,128], index: 1, kind: input, shape index: {}]   ;;  %s1465_s2 = inlined_call_operand.vmem [shape: bf16[128,128], index: 2, kind: input, shape index: {}]   ;;  %s1466_s3 = inlined_call_operand.vmem [shape: bf16[128,128], index: 3, kind: input, shape index: {}]   ;;  %s1467_s4 = inlined_call_operand.vmem [shape: f32[1,128], index: 4, kind: input, shape index: {}]   ;;  %s1468_s5 = inlined_call_operand.vmem [shape: f32[1,128], index: 5, kind: input, shape index: {}]   ;;  %s1469_s6 = inlined_call_operand.vmem [shape: f32[1,128], index: 6, kind: input, shape index: {}]   ;;  %s1470_s7 = inlined_call_operand.vmem [shape: bf16[224,128], index: 7, kind: output, shape index: {}]  }
   0x1 LB: > { %s918_s25 = sadd.s32 4294967295, %s1214_s24   ;;  %p922_p0 = scmp.ge.s32.totalorder %s1214_s24, 1  ;;  %s1214_s24 = sphi %s1258_s24, %s17_s24  }
   0x2   : > { %p238_p1 = scmp.lt.s32.totalorder %s1214_s24, 3 }
   0x4   : > { %p239_p2 = pnand %p922_p0, %p238_p1 }
   0x5   : > { %s270_s28 = smul.u32 (!%p239_p2), 14, %s918_s25 }
   0x6   : > { %242 = sbr.rel (%p239_p2) target bundleno = 673 (0x2a1), region = 48 }
   0x7   : > { %p271_p3 = scmp.lt.s32.totalorder (!%p239_p2), %s270_s28, 27 }
   0xb   : > { %v1191_v0 = vld [vmem:[%s1464_s1] sm:$0xff]   ;;  %v1216_v1 = vmov 0.0   ;;  %vm1217_vm0 = vmmov 0   ;;  %s1472_s28 = smov (!%p271_p3, %s270_s28), 27  ;;  %vm319_vm1 = vcmask 130048   ;;  %v1192_v7 = vld [vmem:[%s1465_s2 + $0x38] sm:$0xff]  }
   0xc   : > { %1061 = vmatprep.subr.bf16.mxu0 %v1216_v1  ;;  %1179 = vmatprep.subr.bf16.mxu1 %v1216_v1  ;;  %s923_s29 = sshll.u32 %s1472_s28, 3  ;;  %v1193_v13 = vld [vmem:[%s1465_s2 + $0x30] sm:$0xff]   ;;  %v1194_v16 = vld [vmem:[%s1465_s2 + $0x28] sm:$0xff]   ;;  %v1195_v22 = vld [vmem:[%s1465_s2 + $0x20] sm:$0xff]  }
   0xd   : > { %1062 = vmatpush3.bf16.msra.mxu0 %v1191_v0  ;;  %1063 = vmatprep.mubr.msk.bf16.mxu0 %vm1217_vm0, %v1216_v1  ;;  %s1283_s9 = scalar_lea.vmem %s1463_s0, %s923_s29  ;;  %v1196_v24 = vld [vmem:[%s1465_s2 + $0x18] sm:$0xff]   ;;  %v1197_v28 = vld [vmem:[%s1465_s2 + $0x10] sm:$0xff]   ;;  %v1198_v29 = vld [vmem:[%s1465_s2 + $0x8] sm:$0xff]   ;;  %s924_s29 = sshll.u32 %s1472_s28, 2 }
   0xe   : > { %1180 = vmatpush3.bf16.msra.mxu1 %v1191_v0  ;;  %1079 = vmatprep.mubr.msk.bf16.mxu1 %vm1217_vm0, %v1216_v1  ;;  %v283_v2 = vld [vmem:[%s1283_s9] sm:$0xff]  ;;  %v284_v3 = vld [vmem:[%s1283_s9 + $0x8] sm:$0xff]  ;;  %v285_v8 = vld [vmem:[%s1283_s9 + $0x10] sm:$0xff] }
   0xf   : > { %1091 = vmatprep.subr.bf16.mxu1 %v1216_v1  ;;  %1135 = vmatprep.subr.bf16.mxu0 %v1216_v1  ;;  %v297_v4 = vpack.c.bf16 %v284_v3, %v283_v2  ;;  %v291_v5 = vld [vmem:[%s1283_s9 + $0x40] sm:$0xff]  ;;  %v292_v6 = vld [vmem:[%s1283_s9 + $0x48] sm:$0xff]  ;;  %v286_v9 = vld [vmem:[%s1283_s9 + $0x18] sm:$0xff] }
  0x10   : > { %v301_v10 = vpack.c.bf16 %v292_v6, %v291_v5  ;;  %v293_v11 = vld [vmem:[%s1283_s9 + $0x50] sm:$0xff]  ;;  %v294_v12 = vld [vmem:[%s1283_s9 + $0x58] sm:$0xff]  ;;  %v298_v14 = vpack.c.bf16 %v286_v9, %v285_v8  ;;  %v287_v17 = vld [vmem:[%s1283_s9 + $0x20] sm:$0xff] }
  0x11   : > { %1064 = vmatmul.mubr.msk.bf16.vlgmr.msra.gmra.mxu0 %vm319_vm1, %v297_v4  ;;  %v302_v15 = vpack.c.bf16 %v294_v12, %v293_v11  ;;  %v288_v18 = vld [vmem:[%s1283_s9 + $0x28] sm:$0xff]  ;;  %v295_v20 = vld [vmem:[%s1283_s9 + $0x60] sm:$0xff]  ;;  %v289_v25 = vld [vmem:[%s1283_s9 + $0x30] sm:$0xff] }
  0x12   : > { %1067 = vmatprep.mubr.msk.bf16.mxu0 %vm1217_vm0, %v1216_v1  ;;  %1080 = vmatmul.mubr.msk.bf16.vlgmr.msra.gmra.mxu1 %vm319_vm1, %v301_v10  ;;  %v299_v19 = vpack.c.bf16 %v288_v18, %v287_v17  ;;  %v296_v21 = vld [vmem:[%s1283_s9 + $0x68] sm:$0xff]  ;;  %v290_v26 = vld [vmem:[%s1283_s9 + $0x38] sm:$0xff]  ;;  %v1199_v30 = vld [vmem:[%s1465_s2] sm:$0xff]   ;;  %s1451_s9 = scalar_lea.vmem %s1470_s7, %s924_s29 }
  0x13   : > { %1083 = vmatprep.mubr.msk.bf16.mxu1 %vm1217_vm0, %v1216_v1  ;;  %1092 = vmatpush3.bf16.msra.mxu1 %v1192_v7  ;;  %v303_v23 = vpack.c.bf16 %v296_v21, %v295_v20  ;;  %v300_v27 = vpack.c.bf16 %v290_v26, %v289_v25  ;;  %v1200_v31 = vld [vmem:[%s1466_s3 + $0x38] sm:$0xff]   ;;  %v1201_v32 = vld [vmem:[%s1466_s3 + $0x30] sm:$0xff]   ;;  %v1202_v33 = vld [vmem:[%s1466_s3 + $0x28] sm:$0xff]  }
  0x14   : > { %1093 = vmatprep.subr.bf16.mxu1 %v1216_v1  ;;  %1136 = vmatpush3.bf16.msra.mxu0 %v1200_v31  ;;  %v1203_v34 = vld [vmem:[%s1466_s3 + $0x20] sm:$0xff]   ;;  %v1204_v35 = vld [vmem:[%s1466_s3 + $0x18] sm:$0xff]   ;;  %v1205_v36 = vld [vmem:[%s1466_s3 + $0x10] sm:$0xff]  }
  0x15   : > { %1137 = vmatprep.subr.bf16.mxu0 %v1216_v1  ;;  %v1378_v37 = vld [vmem:[%s1467_s4] ss:$0 sm:$0xff] }
  0x17   : > { %1094 = vmatpush3.bf16.msra.mxu1 %v1193_v13 }
  0x18   : > { %1095 = vmatprep.subr.bf16.mxu1 %v1216_v1  ;;  %1138 = vmatpush3.bf16.msra.mxu0 %v1201_v32 }
  0x19   : > { %1068 = vmatmul.mubr.msk.bf16.gmra.mxu0 %vm319_vm1, %v298_v14  ;;  %1139 = vmatprep.subr.bf16.mxu0 %v1216_v1 }
  0x1a   : > { %1071 = vmatprep.mubr.msk.bf16.mxu0 %vm1217_vm0, %v1216_v1  ;;  %1084 = vmatmul.mubr.msk.bf16.gmra.mxu1 %vm319_vm1, %v302_v15 }
  0x1b   : > { %1087 = vmatprep.mubr.msk.bf16.mxu1 %vm1217_vm0, %v1216_v1  ;;  %1096 = vmatpush3.bf16.msra.mxu1 %v1194_v16 }
  0x1c   : > { %1097 = vmatprep.subr.bf16.mxu1 %v1216_v1  ;;  %1140 = vmatpush3.bf16.msra.mxu0 %v1202_v33 }
  0x1d   : > { %1141 = vmatprep.subr.bf16.mxu0 %v1216_v1 }
  0x1f   : > { %1098 = vmatpush3.bf16.msra.mxu1 %v1195_v22 }
  0x20   : > { %1099 = vmatprep.subr.bf16.mxu1 %v1216_v1  ;;  %1142 = vmatpush3.bf16.msra.mxu0 %v1203_v34 }
  0x21   : > { %1072 = vmatmul.mubr.msk.bf16.gmra.mxu0 %vm319_vm1, %v299_v19  ;;  %1143 = vmatprep.subr.bf16.mxu0 %v1216_v1 }
  0x22   : > { %1075 = vmatprep.mubr.msk.bf16.mxu0 %vm1217_vm0, %v1216_v1  ;;  %1088 = vmatmul.mubr.msk.bf16.gmra.mxu1 %vm319_vm1, %v303_v23 }
  0x23   : > { %1100 = vmatpush3.bf16.msra.mxu1 %v1196_v24  ;;  %1107 = vmatprep.mubr.msk.bf16.mxu1 %vm1217_vm0, %v1216_v1 }
  0x24   : > { %1101 = vmatprep.subr.bf16.mxu1 %v1216_v1  ;;  %1144 = vmatpush3.bf16.msra.mxu0 %v1204_v35 }
  0x25   : > { %1145 = vmatprep.subr.bf16.mxu0 %v1216_v1 }
  0x27   : > { %1102 = vmatpush3.bf16.msra.mxu1 %v1197_v28 }
  0x28   : > { %1103 = vmatprep.subr.bf16.mxu1 %v1216_v1  ;;  %1146 = vmatpush3.bf16.msra.mxu0 %v1205_v36 }
  0x29   : > { %1076 = vmatmul.mubr.msk.bf16.gmra.mxu0 %vm319_vm1, %v300_v27  ;;  %1147 = vmatprep.subr.bf16.mxu0 %v1216_v1 }
  0x2a   : > { %1151 = vmatprep.mubr.msk.bf16.mxu0 %vm1217_vm0, %v1216_v1 }
  0x2b   : > { %1104 = vmatpush3.bf16.msra.mxu1 %v1198_v29 }
  0x2c   : > { %1105 = vmatprep.subr.bf16.mxu1 %v1216_v1 }
  0x2f   : > { %1106 = vmatpush3.bf16.msra.mxu1 %v1199_v30 }
  0xd1   : > { %v375_v38 = vpop.f32.mrf.mxu0 }
  0xd2   : > { %v376_v40 = vadd.f32 %v1378_v37, %v375_v38  ;;  %v407_v41 = vpop.f32.mrf.mxu1 }
  0xd3   : > { %v1065_v39 = vpop.f32.mrf.mxu0  ;;  %v408_v22 = vadd.f32 %v1378_v37, %v407_v41 }
  0xd4   : > { %v1081_v44 = vpop.f32.mrf.mxu1  ;;  %v430_v46 = vmax.f32 %v376_v40, 0.0  ;;  %v1206_v39 = vld [vmem:[%s1466_s3 + $0x8] sm:$0xff]   ;;  %v1207_v40 = vld [vmem:[%s1466_s3] sm:$0xff]  }
  0xd5   : > { %v378_v42 = vpop.f32.mrf.mxu0  ;;  %v438_v25 = vmax.f32 %v408_v22, 0.0  ;;  %1148 = vmatpush3.bf16.msra.mxu0 %v1206_v39 }
  0xd6   : > { %v379_v43 = vadd.f32 %v1378_v37, %v378_v42  ;;  %v410_v48 = vpop.f32.mrf.mxu1  ;;  %1149 = vmatprep.subr.bf16.mxu0 %v1216_v1 }
  0xd7   : > { %v1066_v45 = vpop.f32.mrf.mxu0  ;;  %v411_v24 = vadd.f32 %v1378_v37, %v410_v48 }
  0xd8   : > { %v431_v47 = vmax.f32 %v379_v43, 0.0  ;;  %v1082_v51 = vpop.f32.mrf.mxu1 }
  0xd9   : > { %v383_v49 = vpop.f32.mrf.mxu0  ;;  %v439_v26 = vmax.f32 %v411_v24, 0.0  ;;  %1150 = vmatpush3.bf16.msra.mxu0 %v1207_v40 }
  0xda   : > { %v444_v50 = vpack.c.bf16 %v431_v47, %v430_v46  ;;  %v384_v53 = vadd.f32 %v1378_v37, %v383_v49  ;;  %v415_v54 = vpop.f32.mrf.mxu1 }
  0xdb   : > { %v1069_v52 = vpop.f32.mrf.mxu0  ;;  %v448_v27 = vpack.c.bf16 %v439_v26, %v438_v25  ;;  %v416_v28 = vadd.f32 %v1378_v37, %v415_v54 }
  0xdc   : > { %1108 = vmatmul.mubr.bf16.vlgmr.msra.gmra.mxu1 %v444_v50  ;;  %v1085_v57 = vpop.f32.mrf.mxu1  ;;  %v432_v59 = vmax.f32 %v384_v53, 0.0 }
  0xdd   : > { %v386_v55 = vpop.f32.mrf.mxu0  ;;  %1111 = vmatprep.mubr.msk.bf16.mxu1 %vm1217_vm0, %v1216_v1  ;;  %v440_v30 = vmax.f32 %v416_v28, 0.0 }
  0xde   : > { %v387_v56 = vadd.f32 %v1378_v37, %v386_v55  ;;  %v418_v61 = vpop.f32.mrf.mxu1 }
  0xdf   : > { %v1070_v58 = vpop.f32.mrf.mxu0  ;;  %v419_v29 = vadd.f32 %v1378_v37, %v418_v61 }
  0xe0   : > { %v433_v60 = vmax.f32 %v387_v56, 0.0  ;;  %v1086_v0 = vpop.f32.mrf.mxu1 }
  0xe1   : > { %v391_v62 = vpop.f32.mrf.mxu0  ;;  %v441_v31 = vmax.f32 %v419_v29, 0.0 }
  0xe2   : > { %v445_v63 = vpack.c.bf16 %v433_v60, %v432_v59  ;;  %v392_v3 = vadd.f32 %v1378_v37, %v391_v62  ;;  %v423_v4 = vpop.f32.mrf.mxu1 }
  0xe3   : > { %v1073_v2 = vpop.f32.mrf.mxu0  ;;  %v449_v32 = vpack.c.bf16 %v441_v31, %v440_v30  ;;  %v424_v33 = vadd.f32 %v1378_v37, %v423_v4 }
  0xe4   : > { %1112 = vmatmul.mubr.bf16.gmra.mxu1 %v445_v63  ;;  %v1089_v7 = vpop.f32.mrf.mxu1  ;;  %v434_v9 = vmax.f32 %v392_v3, 0.0 }
  0xe5   : > { %v394_v5 = vpop.f32.mrf.mxu0  ;;  %1115 = vmatprep.mubr.msk.bf16.mxu1 %vm1217_vm0, %v1216_v1  ;;  %v442_v35 = vmax.f32 %v424_v33, 0.0 }
  0xe6   : > { %v395_v6 = vadd.f32 %v1378_v37, %v394_v5  ;;  %v426_v11 = vpop.f32.mrf.mxu1 }
  0xe7   : > { %v1074_v8 = vpop.f32.mrf.mxu0  ;;  %v427_v34 = vadd.f32 %v1378_v37, %v426_v11 }
  0xe8   : > { %v435_v10 = vmax.f32 %v395_v6, 0.0  ;;  %v1090_v14 = vpop.f32.mrf.mxu1 }
  0xe9   : > { %v399_v12 = vpop.f32.mrf.mxu0  ;;  %v443_v36 = vmax.f32 %v427_v34, 0.0 }
  0xea   : > { %v446_v13 = vpack.c.bf16 %v435_v10, %v434_v9  ;;  %v400_v16 = vadd.f32 %v1378_v37, %v399_v12 }
  0xeb   : > { %v1077_v15 = vpop.f32.mrf.mxu0  ;;  %v450_v38 = vpack.c.bf16 %v443_v36, %v442_v35 }
  0xec   : > { %1116 = vmatmul.mubr.bf16.gmra.mxu1 %v446_v13  ;;  %v436_v20 = vmax.f32 %v400_v16, 0.0 }
  0xed   : > { %v402_v17 = vpop.f32.mrf.mxu0  ;;  %1119 = vmatprep.mubr.msk.bf16.mxu1 %vm1217_vm0, %v1216_v1 }
  0xee   : > { %v403_v18 = vadd.f32 %v1378_v37, %v402_v17  ;;  %v1416_v37 = vld [vmem:[%s1468_s5] ss:$0 sm:$0xff] }
  0xef   : > { %v1078_v19 = vpop.f32.mrf.mxu0 }
  0xf0   : > { %v437_v21 = vmax.f32 %v403_v18, 0.0 }
  0xf2   : > { %v447_v23 = vpack.c.bf16 %v437_v21, %v436_v20 }
  0xf4   : > { %1120 = vmatmul.mubr.bf16.gmra.mxu1 %v447_v23 }
  0xf5   : > { %1123 = vmatprep.mubr.msk.bf16.mxu1 %vm1217_vm0, %v1216_v1 }
  0xfc   : > { %1124 = vmatmul.mubr.bf16.gmra.mxu1 %v448_v27 }
  0xfd   : > { %1127 = vmatprep.mubr.msk.bf16.mxu1 %vm1217_vm0, %v1216_v1 }
 0x104   : > { %1128 = vmatmul.mubr.bf16.gmra.mxu1 %v449_v32 }
 0x105   : > { %1131 = vmatprep.mubr.msk.bf16.mxu1 %vm1217_vm0, %v1216_v1 }
 0x10c   : > { %1132 = vmatmul.mubr.bf16.gmra.mxu1 %v450_v38 }
 0x19c   : > { %v556_v41 = vpop.f32.mrf.mxu1 }
 0x19d   : > { %v557_v43 = vadd.f32 %v1416_v37, %v556_v41 }
 0x19e   : > { %v1109_v42 = vpop.f32.mrf.mxu1 }
 0x19f   : > { %v611_v47 = vmax.f32 %v557_v43, 0.0  ;;  %v943_v43 = vld [vmem:[%s1469_s6] ss:$0 sm:$0xff] }
 0x1a0   : > { %v559_v44 = vpop.f32.mrf.mxu1 }
 0x1a1   : > { %v560_v45 = vadd.f32 %v1416_v37, %v559_v44 }
 0x1a2   : > { %v1110_v46 = vpop.f32.mrf.mxu1 }
 0x1a3   : > { %v612_v48 = vmax.f32 %v560_v45, 0.0 }
 0x1a4   : > { %v564_v49 = vpop.f32.mrf.mxu1 }
 0x1a5   : > { %v625_v50 = vpack.c.bf16 %v612_v48, %v611_v47  ;;  %v565_v52 = vadd.f32 %v1416_v37, %v564_v49 }
 0x1a6   : > { %v1113_v51 = vpop.f32.mrf.mxu1 }
 0x1a7   : > { %1152 = vmatmul.mubr.bf16.vlgmr.msra.gmra.mxu0 %v625_v50  ;;  %v613_v56 = vmax.f32 %v565_v52, 0.0 }
 0x1a8   : > { %v567_v53 = vpop.f32.mrf.mxu1  ;;  %1155 = vmatprep.mubr.msk.bf16.mxu0 %vm1217_vm0, %v1216_v1 }
 0x1a9   : > { %v568_v54 = vadd.f32 %v1416_v37, %v567_v53 }
 0x1aa   : > { %v1114_v55 = vpop.f32.mrf.mxu1 }
 0x1ab   : > { %v614_v57 = vmax.f32 %v568_v54, 0.0 }
 0x1ac   : > { %v572_v58 = vpop.f32.mrf.mxu1 }
 0x1ad   : > { %v626_v59 = vpack.c.bf16 %v614_v57, %v613_v56  ;;  %v573_v61 = vadd.f32 %v1416_v37, %v572_v58 }
 0x1ae   : > { %v1117_v60 = vpop.f32.mrf.mxu1 }
 0x1af   : > { %1156 = vmatmul.mubr.bf16.gmra.mxu0 %v626_v59  ;;  %v615_v2 = vmax.f32 %v573_v61, 0.0 }
 0x1b0   : > { %v575_v62 = vpop.f32.mrf.mxu1  ;;  %1159 = vmatprep.mubr.msk.bf16.mxu0 %vm1217_vm0, %v1216_v1 }
 0x1b1   : > { %v576_v63 = vadd.f32 %v1416_v37, %v575_v62 }
 0x1b2   : > { %v1118_v0 = vpop.f32.mrf.mxu1 }
 0x1b3   : > { %v616_v3 = vmax.f32 %v576_v63, 0.0 }
 0x1b4   : > { %v580_v4 = vpop.f32.mrf.mxu1 }
 0x1b5   : > { %v627_v5 = vpack.c.bf16 %v616_v3, %v615_v2  ;;  %v581_v7 = vadd.f32 %v1416_v37, %v580_v4 }
 0x1b6   : > { %v1121_v6 = vpop.f32.mrf.mxu1 }
 0x1b7   : > { %1160 = vmatmul.mubr.bf16.gmra.mxu0 %v627_v5  ;;  %v617_v11 = vmax.f32 %v581_v7, 0.0 }
 0x1b8   : > { %v583_v8 = vpop.f32.mrf.mxu1  ;;  %1163 = vmatprep.mubr.msk.bf16.mxu0 %vm1217_vm0, %v1216_v1 }
 0x1b9   : > { %v584_v9 = vadd.f32 %v1416_v37, %v583_v8 }
 0x1ba   : > { %v1122_v10 = vpop.f32.mrf.mxu1 }
 0x1bb   : > { %v618_v12 = vmax.f32 %v584_v9, 0.0 }
 0x1bc   : > { %v588_v13 = vpop.f32.mrf.mxu1 }
 0x1bd   : > { %v628_v14 = vpack.c.bf16 %v618_v12, %v617_v11  ;;  %v589_v16 = vadd.f32 %v1416_v37, %v588_v13 }
 0x1be   : > { %v1125_v15 = vpop.f32.mrf.mxu1 }
 0x1bf   : > { %1164 = vmatmul.mubr.bf16.gmra.mxu0 %v628_v14  ;;  %v619_v20 = vmax.f32 %v589_v16, 0.0 }
 0x1c0   : > { %v591_v17 = vpop.f32.mrf.mxu1  ;;  %1167 = vmatprep.mubr.msk.bf16.mxu0 %vm1217_vm0, %v1216_v1 }
 0x1c1   : > { %v592_v18 = vadd.f32 %v1416_v37, %v591_v17 }
 0x1c2   : > { %v1126_v19 = vpop.f32.mrf.mxu1 }
 0x1c3   : > { %v620_v21 = vmax.f32 %v592_v18, 0.0 }
 0x1c4   : > { %v596_v22 = vpop.f32.mrf.mxu1 }
 0x1c5   : > { %v629_v23 = vpack.c.bf16 %v620_v21, %v619_v20  ;;  %v597_v25 = vadd.f32 %v1416_v37, %v596_v22 }
 0x1c6   : > { %v1129_v24 = vpop.f32.mrf.mxu1 }
 0x1c7   : > { %1168 = vmatmul.mubr.bf16.gmra.mxu0 %v629_v23  ;;  %v621_v29 = vmax.f32 %v597_v25, 0.0 }
 0x1c8   : > { %v599_v26 = vpop.f32.mrf.mxu1  ;;  %1171 = vmatprep.mubr.msk.bf16.mxu0 %vm1217_vm0, %v1216_v1 }
 0x1c9   : > { %v600_v27 = vadd.f32 %v1416_v37, %v599_v26 }
 0x1ca   : > { %v1130_v28 = vpop.f32.mrf.mxu1 }
 0x1cb   : > { %v622_v30 = vmax.f32 %v600_v27, 0.0 }
 0x1cc   : > { %v604_v31 = vpop.f32.mrf.mxu1 }
 0x1cd   : > { %v630_v32 = vpack.c.bf16 %v622_v30, %v621_v29  ;;  %v605_v34 = vadd.f32 %v1416_v37, %v604_v31 }
 0x1ce   : > { %v1133_v33 = vpop.f32.mrf.mxu1 }
 0x1cf   : > { %1172 = vmatmul.mubr.bf16.gmra.mxu0 %v630_v32  ;;  %v623_v39 = vmax.f32 %v605_v34, 0.0 }
 0x1d0   : > { %v607_v35 = vpop.f32.mrf.mxu1  ;;  %1175 = vmatprep.mubr.msk.bf16.mxu0 %vm1217_vm0, %v1216_v1 }
 0x1d1   : > { %v608_v36 = vadd.f32 %v1416_v37, %v607_v35 }
 0x1d2   : > { %v1134_v38 = vpop.f32.mrf.mxu1 }
 0x1d3   : > { %v624_v40 = vmax.f32 %v608_v36, 0.0 }
 0x1d5   : > { %v631_v41 = vpack.c.bf16 %v624_v40, %v623_v39 }
 0x1d7   : > { %1176 = vmatmul.mubr.bf16.gmra.mxu0 %v631_v41 }
 0x267   : > { %v737_v42 = vpop.f32.mrf.mxu0 }
 0x268   : > { %v738_v46 = vadd.f32 %v943_v43, %v737_v42 }
 0x269   : > { %v1153_v44 = vpop.f32.mrf.mxu0 }
 0x26b   : > { %v740_v45 = vpop.f32.mrf.mxu0 }
 0x26c   : > { %v741_v47 = vadd.f32 %v943_v43, %v740_v45 }
 0x26d   : > { %v1154_v1 = vpop.f32.mrf.mxu0 }
 0x26e   : > { %v985_v37 = vpack.c.bf16 %v741_v47, %v738_v46 }
 0x26f   : > { %v745_v48 = vpop.f32.mrf.mxu0 }
 0x270   : > { %986 = vst [vmem:[%s1451_s9] sm:$0xff] %v985_v37   ;;  %v746_v51 = vadd.f32 %v943_v43, %v745_v48 }
 0x271   : > { %v1157_v49 = vpop.f32.mrf.mxu0 }
 0x273   : > { %v748_v50 = vpop.f32.mrf.mxu0 }
 0x274   : > { %v749_v52 = vadd.f32 %v943_v43, %v748_v50 }
 0x275   : > { %v1158_v53 = vpop.f32.mrf.mxu0 }
 0x276   : > { %v990_v54 = vpack.c.bf16 %v749_v52, %v746_v51 }
 0x277   : > { %v753_v55 = vpop.f32.mrf.mxu0 }
 0x278   : > { %1017 = vst [vmem:[%s1451_s9 + $0x8] sm:$0xff] %v990_v54   ;;  %v754_v58 = vadd.f32 %v943_v43, %v753_v55 }
 0x279   : > { %v1161_v56 = vpop.f32.mrf.mxu0 }
 0x27b   : > { %v756_v57 = vpop.f32.mrf.mxu0 }
 0x27c   : > { %v757_v59 = vadd.f32 %v943_v43, %v756_v57 }
 0x27d   : > { %v1162_v60 = vpop.f32.mrf.mxu0 }
 0x27e   : > { %v995_v61 = vpack.c.bf16 %v757_v59, %v754_v58 }
 0x27f   : > { %v761_v62 = vpop.f32.mrf.mxu0 }
 0x280   : > { %1018 = vst [vmem:[%s1451_s9 + $0x10] sm:$0xff] %v995_v61   ;;  %v762_v2 = vadd.f32 %v943_v43, %v761_v62 }
 0x281   : > { %v1165_v63 = vpop.f32.mrf.mxu0 }
 0x283   : > { %v764_v0 = vpop.f32.mrf.mxu0 }
 0x284   : > { %v765_v3 = vadd.f32 %v943_v43, %v764_v0 }
 0x285   : > { %v1166_v4 = vpop.f32.mrf.mxu0 }
 0x286   : > { %v1000_v5 = vpack.c.bf16 %v765_v3, %v762_v2 }
 0x287   : > { %v769_v6 = vpop.f32.mrf.mxu0 }
 0x288   : > { %1019 = vst [vmem:[%s1451_s9 + $0x18] sm:$0xff] %v1000_v5   ;;  %v770_v9 = vadd.f32 %v943_v43, %v769_v6 }
 0x289   : > { %v1169_v7 = vpop.f32.mrf.mxu0 }
 0x28b   : > { %v772_v8 = vpop.f32.mrf.mxu0 }
 0x28c   : > { %v773_v10 = vadd.f32 %v943_v43, %v772_v8 }
 0x28d   : > { %v1170_v11 = vpop.f32.mrf.mxu0 }
 0x28e   : > { %v1005_v12 = vpack.c.bf16 %v773_v10, %v770_v9 }
 0x28f   : > { %v777_v13 = vpop.f32.mrf.mxu0 }
 0x290   : > { %1020 = vst [vmem:[%s1451_s9 + $0x20] sm:$0xff] %v1005_v12   ;;  %v778_v16 = vadd.f32 %v943_v43, %v777_v13 }
 0x291   : > { %v1173_v14 = vpop.f32.mrf.mxu0 }
 0x293   : > { %v780_v15 = vpop.f32.mrf.mxu0 }
 0x294   : > { %v781_v17 = vadd.f32 %v943_v43, %v780_v15 }
 0x295   : > { %v1174_v18 = vpop.f32.mrf.mxu0 }
 0x296   : > { %v1010_v19 = vpack.c.bf16 %v781_v17, %v778_v16 }
 0x297   : > { %v785_v20 = vpop.f32.mrf.mxu0 }
 0x298   : > { %1021 = vst [vmem:[%s1451_s9 + $0x28] sm:$0xff] %v1010_v19   ;;  %v786_v23 = vadd.f32 %v943_v43, %v785_v20 }
 0x299   : > { %v1177_v21 = vpop.f32.mrf.mxu0 }
 0x29b   : > { %v788_v22 = vpop.f32.mrf.mxu0 }
 0x29c   : > { %v789_v24 = vadd.f32 %v943_v43, %v788_v22 }
 0x29d   : > { %v1178_v25 = vpop.f32.mrf.mxu0 }
 0x29e   : > { %v1015_v26 = vpack.c.bf16 %v789_v24, %v786_v23 }
 0x2a0   : > { %1022 = vst [vmem:[%s1451_s9 + $0x30] sm:$0xff] %v1015_v26  }
 0x2a1 PF: > { %s17_s24 = sadd.s32 1, %s1214_s24  }
 0x2a2   : > { %p14_p4 = scmp.ge.s32.totalorder %s17_s24, 4  }
 0x2a4   :  { %16 = sbr.rel (!%p14_p4) target bundleno = 1 (0x1), region = 78 }

</bundles_post_ra>
